<compile_context>
chip_gen: v7x
topology: tpu7x:2x2x1
jax: 0.10.0
libtpu: 0.0.40
codegen_flags: <defaults>
</compile_context>

<pallas_src>
import jax
import jax.numpy as jnp
from jax import lax
from jax.experimental import pallas as pl
from jax.experimental.pallas import tpu as pltpu

EPS = 1e-5
CNN_IN = 5625                               # hardcoded Linear(5625, neurons) in the module
TK = 512                                    # contraction-axis tile (multiple of 128)
NUM_K_TILES = pl.cdiv(CNN_IN, TK)           # 11
CNN_IN_PADDED = NUM_K_TILES * TK            # 5632 (W2 rows zero-padded to this)


def _bn_train(x, gamma, beta):
    # BatchNorm1d forward, training mode: batch mean, biased batch variance.
    mu = jnp.mean(x, axis=0, keepdims=True)
    var = jnp.mean((x - mu) ** 2, axis=0, keepdims=True)
    return (x - mu) * lax.rsqrt(var + EPS) * gamma + beta


def two_input_mlp_kernel(prev_ref, cnn_ref, w1_ref, w2_ref, w3t_ref, w3b_ref,
                         pn_ref, po_ref, out_ref, acc_ref):
    k = pl.program_id(0)
    nk = pl.num_programs(0)

    @pl.when(k == 0)
    def _():
        acc_ref[...] = jnp.zeros_like(acc_ref)

    # ---- Branch 2 partial product: (B, TK) activation tile x (TK, N) weight tile.
    # The last K tile extends past 5625; those OOB lanes are undefined, so mask them to
    # zero, then cast to bf16 in VMEM (no extra HBM pass over the activation) and
    # accumulate in f32.
    col = k * TK + lax.broadcasted_iota(jnp.int32, cnn_ref.shape, dimension=1)
    cnn_tile = jnp.where(col < CNN_IN, cnn_ref[...], 0.0).astype(jnp.bfloat16)
    acc_ref[...] += jnp.dot(cnn_tile, w2_ref[...],
                            preferred_element_type=jnp.float32)

    # ---- Epilogue (last K step): biases, ReLUs, BatchNorms, combo head.
    @pl.when(k == nk - 1)
    def _():
        # Packed small params: pn = [b1,g1,be1,b2,g2,be2] (6,N), po = [b3,g3,be3] (3,out).
        b1, g1, be1 = pn_ref[0:1, :], pn_ref[1:2, :], pn_ref[2:3, :]
        b2, g2, be2 = pn_ref[3:4, :], pn_ref[4:5, :], pn_ref[5:6, :]
        b3, g3, be3 = po_ref[0:1, :], po_ref[1:2, :], po_ref[2:3, :]

        # Branch 1 (tiny, all f32): prev_pred_FC = Linear -> ReLU -> BatchNorm1d.
        h1 = jnp.dot(prev_ref[...], w1_ref[...], preferred_element_type=jnp.float32)
        h1 = _bn_train(jnp.maximum(h1 + b1, 0.0), g1, be1)

        # Branch 2 finalize: cnn_output_FC = (accumulated Linear) -> ReLU -> BatchNorm1d.
        h2 = _bn_train(jnp.maximum(acc_ref[...] + b2, 0.0), g2, be2)

        # combo_FC: cat([h1, h2], -1) @ W3 == h1 @ W3_top + h2 @ W3_bot (pre-split halves).
        h3 = (jnp.dot(h1, w3t_ref[...], preferred_element_type=jnp.float32)
              + jnp.dot(h2, w3b_ref[...], preferred_element_type=jnp.float32)
              + b3)
        out_ref[...] = _bn_train(jnp.maximum(h3, 0.0), g3, be3)


def _vmem_limit_bytes(B, P, N, OUT):
    """Per-generation VMEM budget: resident set + double-buffer headroom, capped at 3/4
    of physical VMEM (64 MiB on v7x, 128 MiB on v5e/v6e)."""
    resident = (
        2 * B * TK * 4            # cnn f32 tiles (double buffered)
        + 2 * TK * N * 2          # w2 bf16 tiles (double buffered)
        + B * P * 4 + P * N * 4   # prev, w1 (resident)
        + 2 * N * OUT * 4         # w3 halves
        + (6 * N + 3 * OUT) * 4   # packed small params
        + B * N * 4               # f32 accumulator scratch
        + B * OUT * 4)            # output block
    try:
        cap = pltpu.get_tpu_info().vmem_capacity_bytes
    except Exception:  # pragma: no cover - conservative fallback (v7x physical size)
        cap = 64 * 1024 * 1024
    limit = 2 * resident + (8 << 20)
    limit = max(limit, 16 << 20)
    limit = min(limit, (cap * 3) // 4)
    if resident + (4 << 20) > limit:
        raise ValueError(
            f"Resident VMEM footprint {resident} B does not fit under {limit} B; "
            f"reduce batch size or TK.")
    return int(limit)


def two_input_mlp(previous_predictions, efficientnet_output, packed):
    """Forward pass. `packed` comes from pack_params()."""
    B = previous_predictions.shape[0]
    assert B > 1, "BatchNorm1d training-mode statistics need batch size > 1"

    # forward() flattens both inputs to (B, -1): do that glue in plain JAX (views, no copy).
    prev = previous_predictions.reshape(B, -1).astype(jnp.float32)
    cnn = efficientnet_output.reshape(B, -1).astype(jnp.float32)
    assert cnn.shape[1] == CNN_IN, "cnn_output_FC input size is hardcoded to 5625"

    P = prev.shape[1]
    N = packed["w1"].shape[1]
    OUT = packed["po"].shape[1]

    flops = 2 * B * (P * N + CNN_IN_PADDED * N + 2 * N * OUT)
    bytes_accessed = (prev.size * 4 + cnn.size * 4
                      + packed["w1"].size * 4 + packed["w2p"].size * 2
                      + packed["w3_top"].size * 4 + packed["w3_bot"].size * 4
                      + packed["pn"].size * 4 + packed["po"].size * 4
                      + B * OUT * 4)

    grid_spec = pltpu.PrefetchScalarGridSpec(
        num_scalar_prefetch=0,
        grid=(NUM_K_TILES,),
        in_specs=[
            pl.BlockSpec((B, P), lambda k: (0, 0)),        # prev (resident across K)
            pl.BlockSpec((B, TK), lambda k: (0, k)),       # cnn activation, streamed over K
            pl.BlockSpec((P, N), lambda k: (0, 0)),        # w1 (resident)
            pl.BlockSpec((TK, N), lambda k: (k, 0)),       # w2 (bf16), streamed over K
            pl.BlockSpec((N, OUT), lambda k: (0, 0)),      # w3_top (resident)
            pl.BlockSpec((N, OUT), lambda k: (0, 0)),      # w3_bot (resident)
            pl.BlockSpec((6, N), lambda k: (0, 0)),        # packed N-sized vectors
            pl.BlockSpec((3, OUT), lambda k: (0, 0)),      # packed OUT-sized vectors
        ],
        out_specs=pl.BlockSpec((B, OUT), lambda k: (0, 0)),  # resident, written on last step
        scratch_shapes=[pltpu.VMEM((B, N), jnp.float32)],
    )

    return pl.pallas_call(
        two_input_mlp_kernel,
        out_shape=jax.ShapeDtypeStruct((B, OUT), jnp.float32),
        grid_spec=grid_spec,
        cost_estimate=pl.CostEstimate(
            flops=flops,
            transcendentals=2 * N + OUT,   # the three rsqrt vectors
            bytes_accessed=bytes_accessed),
        compiler_params=pltpu.CompilerParams(
            dimension_semantics=("arbitrary",),            # K is a reduction axis
            vmem_limit_bytes=_vmem_limit_bytes(B, P, N, OUT)),
    )(prev, cnn, packed["w1"], packed["w2p"], packed["w3_top"], packed["w3_bot"],
      packed["pn"], packed["po"])


def init_params(key, previous_predictions_size, neurons, output_size):
    """Deterministic synthetic init mimicking the module's layer shapes (PyTorch layout)."""
    ks = jax.random.split(key, 9)

    def linear(kw, kb, fan_in, fan_out):
        bound = 1.0 / jnp.sqrt(fan_in)
        w = jax.random.uniform(kw, (fan_in, fan_out), jnp.float32, -bound, bound)
        b = jax.random.uniform(kb, (1, fan_out), jnp.float32, -bound, bound)
        return w, b

    w1, b1 = linear(ks[0], ks[1], previous_predictions_size, neurons)
    w2, b2 = linear(ks[2], ks[3], CNN_IN, neurons)
    w3, b3 = linear(ks[4], ks[5], 2 * neurons, output_size)

    # BatchNorm affine params (non-trivial, deterministic).
    g1 = 1.0 + 0.1 * jax.random.normal(ks[6], (1, neurons), jnp.float32)
    be1 = 0.1 * jax.random.normal(ks[7], (1, neurons), jnp.float32)
    g2 = jnp.ones((1, neurons), jnp.float32) * 0.9
    be2 = jnp.full((1, neurons), 0.05, jnp.float32)
    g3 = jnp.ones((1, output_size), jnp.float32)
    be3 = jnp.zeros((1, output_size), jnp.float32)

    return {"w1": w1, "b1": b1, "g1": g1, "be1": be1,
            "w2": w2, "b2": b2, "g2": g2, "be2": be2,
            "w3": w3, "b3": b3, "g3": g3, "be3": be3}


def pack_params(raw):
    """One-time repack into kernel-friendly layout."""
    N = raw["w1"].shape[1]
    # W2: (5625, N) -> zero-pad K to 5632 (grid-aligned), keep canonical (K, N) layout, bf16
    # so the dominant weight stream is halved while the MXU contracts lanes-vs-sublanes
    # natively (no transposed-RHS relayout).
    w2p = jnp.pad(raw["w2"], ((0, CNN_IN_PADDED - CNN_IN), (0, 0))).astype(jnp.bfloat16)
    # W3 pre-split into the two concat halves (layout-free for any `neurons`).
    w3_top = raw["w3"][:N, :].astype(jnp.float32)
    w3_bot = raw["w3"][N:, :].astype(jnp.float32)
    # Pack the 9 tiny (1, X) vectors into two stacked arrays (one DMA each).
    pn = jnp.concatenate([raw["b1"], raw["g1"], raw["be1"],
                          raw["b2"], raw["g2"], raw["be2"]], axis=0)   # (6, N)
    po = jnp.concatenate([raw["b3"], raw["g3"], raw["be3"]], axis=0)   # (3, out)
    return {"w1": raw["w1"].astype(jnp.float32),
            "w2p": w2p,
            "w3_top": w3_top, "w3_bot": w3_bot,
            "pn": pn.astype(jnp.float32),
            "po": po.astype(jnp.float32)}


def reference(previous_predictions, efficientnet_output, raw):
    """Pure-JAX reference mirroring the PyTorch forward (training-mode BN).
    The cnn-branch matmul uses the same bf16-input / f32-accumulate numerics as the
    kernel, so the only kernel-vs-reference delta is f32 summation order across K tiles."""
    B = previous_predictions.shape[0]
    prev = previous_predictions.reshape(B, -1).astype(jnp.float32)
    cnn = efficientnet_output.reshape(B, -1).astype(jnp.float32)
    h1 = _bn_train(jnp.maximum(prev @ raw["w1"] + raw["b1"], 0.0), raw["g1"], raw["be1"])
    h2 = jnp.dot(cnn.astype(jnp.bfloat16), raw["w2"].astype(jnp.bfloat16),
                 preferred_element_type=jnp.float32)
    h2 = _bn_train(jnp.maximum(h2 + raw["b2"], 0.0), raw["g2"], raw["be2"])
    x = jnp.concatenate([h1, h2], axis=-1)
    h3 = jnp.maximum(x @ raw["w3"] + raw["b3"], 0.0)
    return _bn_train(h3, raw["g3"], raw["be3"])


if __name__ == "__main__":
    key = jax.random.PRNGKey(0)
    k_prev, k_cnn, k_par = jax.random.split(key, 3)

    # NOTE: demo shapes are launch-overhead bound; the pipelined K-grid pays off at
    # production batch sizes.
    B = 4
    previous_predictions_size = 16
    neurons = 32
    output_size = 8

    # previous_predictions given with trailing structure; forward flattens it.
    previous_predictions = jax.random.normal(k_prev, (B, 4, 4), jnp.float32)      # -> (B, 16)
    efficientnet_output = jax.random.normal(k_cnn, (B, 1, 75, 75), jnp.float32)   # -> (B, 5625)

    raw = init_params(k_par, previous_predictions_size, neurons, output_size)
    packed = pack_params(raw)

    out = two_input_mlp(previous_predictions, efficientnet_output, packed)
    out = jax.block_until_ready(out)

    ref = reference(previous_predictions, efficientnet_output, raw)
    assert out.shape == (B, output_size)
    err = float(jnp.max(jnp.abs(out - ref)))
    assert err < 2e-3, f"mismatch vs pure-JAX reference: {err}"

    print("KERNEL_OK")
</pallas_src>

<mosaic_0001>
module attributes {stable_mosaic.version = 11 : i64} {
  func.func @two_input_mlp_kernel(%arg0: i32, %arg1: memref<4x16xf32, #tpu.memory_space<vmem>>, %arg2: memref<4x512xf32, #tpu.memory_space<vmem>>, %arg3: memref<16x32xf32, #tpu.memory_space<vmem>>, %arg4: memref<512x32xbf16, #tpu.memory_space<vmem>>, %arg5: memref<32x8xf32, #tpu.memory_space<vmem>>, %arg6: memref<32x8xf32, #tpu.memory_space<vmem>>, %arg7: memref<6x32xf32, #tpu.memory_space<vmem>>, %arg8: memref<3x8xf32, #tpu.memory_space<vmem>>, %arg9: memref<4x8xf32, #tpu.memory_space<vmem>>, %arg10: memref<4x32xf32, #tpu.memory_space<vmem>>) attributes {dimension_semantics = [#tpu.dimension_semantics<arbitrary>], iteration_bounds = array<i64: 11>, scalar_prefetch = 0 : i64, scratch_operands = 1 : i64, tpu.core_type = #tpu.core_type<tc>, window_params = [{pipeline_mode = #tpu.pipeline_mode<synchronous>, transform_indices = @transform_0, window_bounds = array<i64: 4, 16>}, {transform_indices = @transform_1, window_bounds = array<i64: 4, 512>}, {pipeline_mode = #tpu.pipeline_mode<synchronous>, transform_indices = @transform_2, window_bounds = array<i64: 16, 32>}, {transform_indices = @transform_3, window_bounds = array<i64: 512, 32>}, {pipeline_mode = #tpu.pipeline_mode<synchronous>, transform_indices = @transform_4, window_bounds = array<i64: 32, 8>}, {pipeline_mode = #tpu.pipeline_mode<synchronous>, transform_indices = @transform_5, window_bounds = array<i64: 32, 8>}, {pipeline_mode = #tpu.pipeline_mode<synchronous>, transform_indices = @transform_6, window_bounds = array<i64: 6, 32>}, {pipeline_mode = #tpu.pipeline_mode<synchronous>, transform_indices = @transform_7, window_bounds = array<i64: 3, 8>}, {pipeline_mode = #tpu.pipeline_mode<synchronous>, transform_indices = @transform_8, window_bounds = array<i64: 4, 8>}]} {
    %c0_i32 = arith.constant 0 : i32
    %0 = arith.cmpi eq, %arg0, %c0_i32 : i32
    %1 = arith.extui %0 : i1 to i32
    %c0_i32_0 = arith.constant 0 : i32
    %2 = arith.cmpi ne, %1, %c0_i32_0 : i32
    scf.if %2 {
      %cst_10 = arith.constant 0.000000e+00 : f32
      %21 = vector.broadcast %cst_10 : f32 to vector<4x32xf32>
      %c0_11 = arith.constant 0 : index
      %c0_12 = arith.constant 0 : index
      %22 = vector.load %arg10[%c0_11, %c0_12] : memref<4x32xf32, #tpu.memory_space<vmem>>, vector<4x32xf32>
      tpu.vector_store %arg10[%c0_11, %c0_12], %21 {strides = array<i32>} : memref<4x32xf32, #tpu.memory_space<vmem>>, vector<4x32xf32>,
    } else {
    }
    %c512_i32 = arith.constant 512 : i32
    %3 = arith.muli %arg0, %c512_i32 : i32
    %4 = tpu.iota {dimensions = array<i32: 1>} : vector<4x512xi32>
    %5 = vector.broadcast %3 : i32 to vector<4x512xi32>
    %6 = arith.addi %5, %4 : vector<4x512xi32>
    %c5625_i32 = arith.constant 5625 : i32
    %7 = vector.broadcast %c5625_i32 : i32 to vector<4x512xi32>
    %8 = arith.cmpi slt, %6, %7 : vector<4x512xi32>
    %c0 = arith.constant 0 : index
    %c0_1 = arith.constant 0 : index
    %9 = vector.load %arg2[%c0, %c0_1] : memref<4x512xf32, #tpu.memory_space<vmem>>, vector<4x512xf32>
    %cst = arith.constant 0.000000e+00 : f32
    %10 = vector.broadcast %cst : f32 to vector<4x512xf32>
    %11 = arith.select %8, %9, %10 : vector<4x512xi1>, vector<4x512xf32>
    %12 = arith.truncf %11 : vector<4x512xf32> to vector<4x512xbf16>
    %c0_2 = arith.constant 0 : index
    %c0_3 = arith.constant 0 : index
    %13 = vector.load %arg10[%c0_2, %c0_3] : memref<4x32xf32, #tpu.memory_space<vmem>>, vector<4x32xf32>
    %c0_4 = arith.constant 0 : index
    %c0_5 = arith.constant 0 : index
    %14 = vector.load %arg4[%c0_4, %c0_5] : memref<512x32xbf16, #tpu.memory_space<vmem>>, vector<512x32xbf16>
    %cst_6 = arith.constant dense<0.000000e+00> : vector<4x32xf32>
    %15 = tpu.matmul %12, %14, %cst_6 {dimension_numbers = #tpu.dot_dimension_numbers<[1], [0], [0], [1], [0, 0, 1, 1], [], []>} : vector<4x512xbf16>, vector<512x32xbf16>, vector<4x32xf32> -> vector<4x32xf32>
    %16 = arith.addf %13, %15 : vector<4x32xf32>
    %c0_7 = arith.constant 0 : index
    %c0_8 = arith.constant 0 : index
    %17 = vector.load %arg10[%c0_7, %c0_8] : memref<4x32xf32, #tpu.memory_space<vmem>>, vector<4x32xf32>
    tpu.vector_store %arg10[%c0_7, %c0_8], %16 {strides = array<i32>} : memref<4x32xf32, #tpu.memory_space<vmem>>, vector<4x32xf32>,
    %c10_i32 = arith.constant 10 : i32
    %18 = arith.cmpi eq, %arg0, %c10_i32 : i32
    %19 = arith.extui %18 : i1 to i32
    %c0_i32_9 = arith.constant 0 : i32
    %20 = arith.cmpi ne, %19, %c0_i32_9 : i32
    scf.if %20 {
      %c0_10 = arith.constant 0 : index
      %c0_11 = arith.constant 0 : index
      %21 = vector.load %arg7[%c0_10, %c0_11] : memref<6x32xf32, #tpu.memory_space<vmem>>, vector<1x32xf32>
      %c1 = arith.constant 1 : index
      %c0_12 = arith.constant 0 : index
      %22 = vector.load %arg7[%c1, %c0_12] : memref<6x32xf32, #tpu.memory_space<vmem>>, vector<1x32xf32>
      %c2 = arith.constant 2 : index
      %c0_13 = arith.constant 0 : index
      %23 = vector.load %arg7[%c2, %c0_13] : memref<6x32xf32, #tpu.memory_space<vmem>>, vector<1x32xf32>
      %c3 = arith.constant 3 : index
      %c0_14 = arith.constant 0 : index
      %24 = vector.load %arg7[%c3, %c0_14] : memref<6x32xf32, #tpu.memory_space<vmem>>, vector<1x32xf32>
      %c4 = arith.constant 4 : index
      %c0_15 = arith.constant 0 : index
      %25 = vector.load %arg7[%c4, %c0_15] : memref<6x32xf32, #tpu.memory_space<vmem>>, vector<1x32xf32>
      %c5 = arith.constant 5 : index
      %c0_16 = arith.constant 0 : index
      %26 = vector.load %arg7[%c5, %c0_16] : memref<6x32xf32, #tpu.memory_space<vmem>>, vector<1x32xf32>
      %c0_17 = arith.constant 0 : index
      %c0_18 = arith.constant 0 : index
      %27 = vector.load %arg8[%c0_17, %c0_18] : memref<3x8xf32, #tpu.memory_space<vmem>>, vector<1x8xf32>
      %c1_19 = arith.constant 1 : index
      %c0_20 = arith.constant 0 : index
      %28 = vector.load %arg8[%c1_19, %c0_20] : memref<3x8xf32, #tpu.memory_space<vmem>>, vector<1x8xf32>
      %c2_21 = arith.constant 2 : index
      %c0_22 = arith.constant 0 : index
      %29 = vector.load %arg8[%c2_21, %c0_22] : memref<3x8xf32, #tpu.memory_space<vmem>>, vector<1x8xf32>
      %c0_23 = arith.constant 0 : index
      %c0_24 = arith.constant 0 : index
      %30 = vector.load %arg1[%c0_23, %c0_24] : memref<4x16xf32, #tpu.memory_space<vmem>>, vector<4x16xf32>
      %c0_25 = arith.constant 0 : index
      %c0_26 = arith.constant 0 : index
      %31 = vector.load %arg3[%c0_25, %c0_26] : memref<16x32xf32, #tpu.memory_space<vmem>>, vector<16x32xf32>
      %cst_27 = arith.constant dense<0.000000e+00> : vector<4x32xf32>
      %32 = tpu.matmul %30, %31, %cst_27 {dimension_numbers = #tpu.dot_dimension_numbers<[1], [0], [0], [1], [0, 0, 1, 1], [], []>} : vector<4x16xf32>, vector<16x32xf32>, vector<4x32xf32> -> vector<4x32xf32>
      %33 = vector.broadcast %21 : vector<1x32xf32> to vector<4x32xf32>
      %34 = arith.addf %32, %33 : vector<4x32xf32>
      %cst_28 = arith.constant 0.000000e+00 : f32
      %35 = vector.broadcast %cst_28 : f32 to vector<4x32xf32>
      %36 = arith.maximumf %34, %35 : vector<4x32xf32>
      %cst_29 = arith.constant dense<0.000000e+00> : vector<32xf32>
      %37 = vector.multi_reduction <add>, %36, %cst_29 [0] : vector<4x32xf32> to vector<32xf32>
      %38 = vector.shape_cast %37 : vector<32xf32> to vector<1x32xf32>
      %cst_30 = arith.constant 4.000000e+00 : f32
      %39 = vector.broadcast %cst_30 : f32 to vector<1x32xf32>
      %40 = arith.divf %38, %39 : vector<1x32xf32>
      %41 = vector.broadcast %40 : vector<1x32xf32> to vector<4x32xf32>
      %42 = arith.subf %36, %41 : vector<4x32xf32>
      %43 = arith.mulf %42, %42 : vector<4x32xf32>
      %cst_31 = arith.constant dense<0.000000e+00> : vector<32xf32>
      %44 = vector.multi_reduction <add>, %43, %cst_31 [0] : vector<4x32xf32> to vector<32xf32>
      %45 = vector.shape_cast %44 : vector<32xf32> to vector<1x32xf32>
      %cst_32 = arith.constant 4.000000e+00 : f32
      %46 = vector.broadcast %cst_32 : f32 to vector<1x32xf32>
      %47 = arith.divf %45, %46 : vector<1x32xf32>
      %48 = vector.broadcast %40 : vector<1x32xf32> to vector<4x32xf32>
      %49 = arith.subf %36, %48 : vector<4x32xf32>
      %cst_33 = arith.constant 9.99999974E-6 : f32
      %50 = vector.broadcast %cst_33 : f32 to vector<1x32xf32>
      %51 = arith.addf %47, %50 : vector<1x32xf32>
      %52 = math.rsqrt %51 : vector<1x32xf32>
      %53 = vector.broadcast %52 : vector<1x32xf32> to vector<4x32xf32>
      %54 = arith.mulf %49, %53 : vector<4x32xf32>
      %55 = vector.broadcast %22 : vector<1x32xf32> to vector<4x32xf32>
      %56 = arith.mulf %54, %55 : vector<4x32xf32>
      %57 = vector.broadcast %23 : vector<1x32xf32> to vector<4x32xf32>
      %58 = arith.addf %56, %57 : vector<4x32xf32>
      %c0_34 = arith.constant 0 : index
      %c0_35 = arith.constant 0 : index
      %59 = vector.load %arg10[%c0_34, %c0_35] : memref<4x32xf32, #tpu.memory_space<vmem>>, vector<4x32xf32>
      %60 = vector.broadcast %24 : vector<1x32xf32> to vector<4x32xf32>
      %61 = arith.addf %59, %60 : vector<4x32xf32>
      %cst_36 = arith.constant 0.000000e+00 : f32
      %62 = vector.broadcast %cst_36 : f32 to vector<4x32xf32>
      %63 = arith.maximumf %61, %62 : vector<4x32xf32>
      %cst_37 = arith.constant dense<0.000000e+00> : vector<32xf32>
      %64 = vector.multi_reduction <add>, %63, %cst_37 [0] : vector<4x32xf32> to vector<32xf32>
      %65 = vector.shape_cast %64 : vector<32xf32> to vector<1x32xf32>
      %cst_38 = arith.constant 4.000000e+00 : f32
      %66 = vector.broadcast %cst_38 : f32 to vector<1x32xf32>
      %67 = arith.divf %65, %66 : vector<1x32xf32>
      %68 = vector.broadcast %67 : vector<1x32xf32> to vector<4x32xf32>
      %69 = arith.subf %63, %68 : vector<4x32xf32>
      %70 = arith.mulf %69, %69 : vector<4x32xf32>
      %cst_39 = arith.constant dense<0.000000e+00> : vector<32xf32>
      %71 = vector.multi_reduction <add>, %70, %cst_39 [0] : vector<4x32xf32> to vector<32xf32>
      %72 = vector.shape_cast %71 : vector<32xf32> to vector<1x32xf32>
      %cst_40 = arith.constant 4.000000e+00 : f32
      %73 = vector.broadcast %cst_40 : f32 to vector<1x32xf32>
      %74 = arith.divf %72, %73 : vector<1x32xf32>
      %75 = vector.broadcast %67 : vector<1x32xf32> to vector<4x32xf32>
      %76 = arith.subf %63, %75 : vector<4x32xf32>
      %cst_41 = arith.constant 9.99999974E-6 : f32
      %77 = vector.broadcast %cst_41 : f32 to vector<1x32xf32>
      %78 = arith.addf %74, %77 : vector<1x32xf32>
      %79 = math.rsqrt %78 : vector<1x32xf32>
      %80 = vector.broadcast %79 : vector<1x32xf32> to vector<4x32xf32>
      %81 = arith.mulf %76, %80 : vector<4x32xf32>
      %82 = vector.broadcast %25 : vector<1x32xf32> to vector<4x32xf32>
      %83 = arith.mulf %81, %82 : vector<4x32xf32>
      %84 = vector.broadcast %26 : vector<1x32xf32> to vector<4x32xf32>
      %85 = arith.addf %83, %84 : vector<4x32xf32>
      %c0_42 = arith.constant 0 : index
      %c0_43 = arith.constant 0 : index
      %86 = vector.load %arg5[%c0_42, %c0_43] : memref<32x8xf32, #tpu.memory_space<vmem>>, vector<32x8xf32>
      %cst_44 = arith.constant dense<0.000000e+00> : vector<4x8xf32>
      %87 = tpu.matmul %58, %86, %cst_44 {dimension_numbers = #tpu.dot_dimension_numbers<[1], [0], [0], [1], [0, 0, 1, 1], [], []>} : vector<4x32xf32>, vector<32x8xf32>, vector<4x8xf32> -> vector<4x8xf32>
      %c0_45 = arith.constant 0 : index
      %c0_46 = arith.constant 0 : index
      %88 = vector.load %arg6[%c0_45, %c0_46] : memref<32x8xf32, #tpu.memory_space<vmem>>, vector<32x8xf32>
      %cst_47 = arith.constant dense<0.000000e+00> : vector<4x8xf32>
      %89 = tpu.matmul %85, %88, %cst_47 {dimension_numbers = #tpu.dot_dimension_numbers<[1], [0], [0], [1], [0, 0, 1, 1], [], []>} : vector<4x32xf32>, vector<32x8xf32>, vector<4x8xf32> -> vector<4x8xf32>
      %90 = arith.addf %87, %89 : vector<4x8xf32>
      %91 = vector.broadcast %27 : vector<1x8xf32> to vector<4x8xf32>
      %92 = arith.addf %90, %91 : vector<4x8xf32>
      %cst_48 = arith.constant 0.000000e+00 : f32
      %93 = vector.broadcast %cst_48 : f32 to vector<4x8xf32>
      %94 = arith.maximumf %92, %93 : vector<4x8xf32>
      %cst_49 = arith.constant dense<0.000000e+00> : vector<8xf32>
      %95 = vector.multi_reduction <add>, %94, %cst_49 [0] : vector<4x8xf32> to vector<8xf32>
      %96 = vector.shape_cast %95 : vector<8xf32> to vector<1x8xf32>
      %cst_50 = arith.constant 4.000000e+00 : f32
      %97 = vector.broadcast %cst_50 : f32 to vector<1x8xf32>
      %98 = arith.divf %96, %97 : vector<1x8xf32>
      %99 = vector.broadcast %98 : vector<1x8xf32> to vector<4x8xf32>
      %100 = arith.subf %94, %99 : vector<4x8xf32>
      %101 = arith.mulf %100, %100 : vector<4x8xf32>
      %cst_51 = arith.constant dense<0.000000e+00> : vector<8xf32>
      %102 = vector.multi_reduction <add>, %101, %cst_51 [0] : vector<4x8xf32> to vector<8xf32>
      %103 = vector.shape_cast %102 : vector<8xf32> to vector<1x8xf32>
      %cst_52 = arith.constant 4.000000e+00 : f32
      %104 = vector.broadcast %cst_52 : f32 to vector<1x8xf32>
      %105 = arith.divf %103, %104 : vector<1x8xf32>
      %106 = vector.broadcast %98 : vector<1x8xf32> to vector<4x8xf32>
      %107 = arith.subf %94, %106 : vector<4x8xf32>
      %cst_53 = arith.constant 9.99999974E-6 : f32
      %108 = vector.broadcast %cst_53 : f32 to vector<1x8xf32>
      %109 = arith.addf %105, %108 : vector<1x8xf32>
      %110 = math.rsqrt %109 : vector<1x8xf32>
      %111 = vector.broadcast %110 : vector<1x8xf32> to vector<4x8xf32>
      %112 = arith.mulf %107, %111 : vector<4x8xf32>
      %113 = vector.broadcast %28 : vector<1x8xf32> to vector<4x8xf32>
      %114 = arith.mulf %112, %113 : vector<4x8xf32>
      %115 = vector.broadcast %29 : vector<1x8xf32> to vector<4x8xf32>
      %116 = arith.addf %114, %115 : vector<4x8xf32>
      %c0_54 = arith.constant 0 : index
      %c0_55 = arith.constant 0 : index
      %117 = vector.load %arg9[%c0_54, %c0_55] : memref<4x8xf32, #tpu.memory_space<vmem>>, vector<4x8xf32>
      tpu.vector_store %arg9[%c0_54, %c0_55], %116 {strides = array<i32>} : memref<4x8xf32, #tpu.memory_space<vmem>>, vector<4x8xf32>,
    } else {
    }
    return
  }
  func.func @transform_0(%arg0: i32) -> (i32, i32) {
    %c0_i32 = arith.constant 0 : i32
    %c0_i32_0 = arith.constant 0 : i32
    %c0_i32_1 = arith.constant 0 : i32
    return %c0_i32, %c0_i32_0 : i32, i32
  }
  func.func @transform_1(%arg0: i32) -> (i32, i32) {
    %c0_i32 = arith.constant 0 : i32
    %c0_i32_0 = arith.constant 0 : i32
    return %c0_i32, %arg0 : i32, i32
  }
  func.func @transform_2(%arg0: i32) -> (i32, i32) {
    %c0_i32 = arith.constant 0 : i32
    %c0_i32_0 = arith.constant 0 : i32
    %c0_i32_1 = arith.constant 0 : i32
    return %c0_i32, %c0_i32_0 : i32, i32
  }
  func.func @transform_3(%arg0: i32) -> (i32, i32) {
    %c0_i32 = arith.constant 0 : i32
    %c0_i32_0 = arith.constant 0 : i32
    return %arg0, %c0_i32 : i32, i32
  }
  func.func @transform_4(%arg0: i32) -> (i32, i32) {
    %c0_i32 = arith.constant 0 : i32
    %c0_i32_0 = arith.constant 0 : i32
    %c0_i32_1 = arith.constant 0 : i32
    return %c0_i32, %c0_i32_0 : i32, i32
  }
  func.func @transform_5(%arg0: i32) -> (i32, i32) {
    %c0_i32 = arith.constant 0 : i32
    %c0_i32_0 = arith.constant 0 : i32
    %c0_i32_1 = arith.constant 0 : i32
    return %c0_i32, %c0_i32_0 : i32, i32
  }
  func.func @transform_6(%arg0: i32) -> (i32, i32) {
    %c0_i32 = arith.constant 0 : i32
    %c0_i32_0 = arith.constant 0 : i32
    %c0_i32_1 = arith.constant 0 : i32
    return %c0_i32, %c0_i32_0 : i32, i32
  }
  func.func @transform_7(%arg0: i32) -> (i32, i32) {
    %c0_i32 = arith.constant 0 : i32
    %c0_i32_0 = arith.constant 0 : i32
    %c0_i32_1 = arith.constant 0 : i32
    return %c0_i32, %c0_i32_0 : i32, i32
  }
  func.func @transform_8(%arg0: i32) -> (i32, i32) {
    %c0_i32 = arith.constant 0 : i32
    %c0_i32_0 = arith.constant 0 : i32
    %c0_i32_1 = arith.constant 0 : i32
    return %c0_i32, %c0_i32_0 : i32, i32
  }
}

</mosaic_0001>

<bundles_post_ra>
// kernel: tpu_custom_call.1
= control target key start
LH: loop header
LB: loop body
LE: loop exit
PB: predicated region body
PF: predicated region fallthrough
CT: control target
= control target key end

     0   :  { %13 = vsyncpa [#allocation4], 0  ;;  %s1430_s27 = smov 0   ;;  %s1585_s0 = inlined_call_operand.vmem [shape: f32[4,16], index: 0, kind: input, shape index: {}]   ;;  %s1586_s1 = inlined_call_operand.vmem [shape: f32[4,5625], index: 1, kind: input, shape index: {}]   ;;  %s1587_s2 = inlined_call_operand.vmem [shape: f32[16,32], index: 2, kind: input, shape index: {}]   ;;  %s1588_s3 = inlined_call_operand.vmem [shape: bf16[5632,32], index: 3, kind: input, shape index: {}]   ;;  %s1589_s4 = inlined_call_operand.vmem [shape: f32[32,8], index: 4, kind: input, shape index: {}]   ;;  %s1590_s5 = inlined_call_operand.vmem [shape: f32[32,8], index: 5, kind: input, shape index: {}]   ;;  %s1591_s6 = inlined_call_operand.vmem [shape: f32[6,32], index: 6, kind: input, shape index: {}]   ;;  %s1592_s7 = inlined_call_operand.vmem [shape: f32[3,8], index: 7, kind: input, shape index: {}]   ;;  %s1593_s8 = inlined_call_operand.hbm [shape: f32[4,8], index: 8, kind: output, shape index: {}]  }
   0x1 LB: > { %s1436_s28 = sadd.s32 4294967295, %s1378_s27   ;;  %p1114_p0 = scmp.ge.s32.totalorder %s1378_s27, 1  ;;  %s1378_s27 = sphi %s1430_s27, %s19_s27  }
   0x2   : > { %p270_p1 = scmp.lt.s32.totalorder %s1378_s27, 12 }
   0x4   : > { %p271_p2 = pnand %p1114_p0, %p270_p1 }
   0x5   : > { %s1115_s29 = sshll.u32 (!%p271_p2), %s1436_s28, 2  ;;  %s1117_s30 = sshll.u32 (!%p271_p2), %s1436_s28, 6 }
   0x6   : > { %274 = sbr.rel (%p271_p2) target bundleno = 835 (0x343), region = 52  ;;  %p305_p3 = scmp.lt.s32.totalorder (!%p271_p2), %s1115_s29, 43 }
   0x7   : > { %p311_p4 = scmp.lt.s32.totalorder (!%p271_p2), %s1117_s30, 703  ;;  %p1119_p5 = scmp.ne.s32.totalorder (!%p271_p2), %s1436_s28, 0 }
   0xd   : > { %s1595_s29 = smov (!%p305_p3, %s1115_s29), 43  ;;  %s1597_s30 = smov (!%p311_p4, %s1117_s30), 703 }
   0xe   : > { %s1116_s9 = sshll.u32 %s1595_s29, 2  ;;  %s1118_s13 = sshll.u32 %s1597_s30, 2  ;;  %vm321_vm0 = vcmask (!%p1119_p5), 257024   ;;  %v1380_v0 = vmov (!%p1119_p5), 0.0  }
   0xf   : > { %s1445_s12 = scalar_lea.vmem %s1586_s1, %s1116_s9  ;;  %s1450_s16 = scalar_lea.vmem %s1588_s3, %s1118_s13  ;;  %322 = vst.msk [vmem:[#allocation2] sm:$0xf] (!%p1119_p5), %vm321_vm0, %v1380_v0 }
  0x10   : > { %320 = sbr.rel (%p1119_p5) target bundleno = 23 (0x17), region = 56 }
  0x17 PF: > { %v1302_v1 = vld [vmem:[%s1450_s16 + $0x40] sm:$0xff]   ;;  %v1306_v5 = vld [vmem:[%s1450_s16 + $0x48] sm:$0xff]   ;;  %v1310_v9 = vld [vmem:[%s1450_s16 + $0x50] sm:$0xff]   ;;  %v324_v15 = vlaneseq  ;;  %s1120_s17 = sshll.u32 %s1436_s28, 9  ;;  %vm692_vm9 = vcmask 257024   ;;  %p1165_p6 = scmp.ne.s32.totalorder %s1436_s28, 10 }
  0x18   : > { %v1303_v2 = vld [vmem:[%s1450_s16 + $0xc0] sm:$0xff]   ;;  %1182 = vmatprep.subr.bf16.mxu0 %v1302_v1  ;;  %v1307_v6 = vld [vmem:[%s1450_s16 + $0xc8] sm:$0xff]   ;;  %v1311_v10 = vld [vmem:[%s1450_s16 + $0xd0] sm:$0xff]   ;;  %v329_v27 = vstv %s1120_s17  ;;  %vm1382_vm10 = vmmov (!%p1165_p6), 0   ;;  %vm714_vm11 = vcmask (!%p1165_p6), 130048   ;;  %vm867_vm12 = vcmask (!%p1165_p6), 261120  }
  0x19   : > { %v1304_v3 = vld [vmem:[%s1450_s16] sm:$0xff]   ;;  %1204 = vmatprep.subr.bf16.mxu1 %v1303_v2  ;;  %v1308_v7 = vld [vmem:[%s1450_s16 + $0x8] sm:$0xff]   ;;  %v1312_v11 = vld [vmem:[%s1450_s16 + $0x10] sm:$0xff]   ;;  %v325_v20 = vand.u32 127, %v324_v15  ;;  %v1381_v2 = vmov (!%p1165_p6), 0.0|0.0   ;;  %vm1020_vm13 = vcmask (!%p1165_p6), 60416  }
  0x1a   : > { %v1305_v4 = vld [vmem:[%s1450_s16 + $0x80] sm:$0xff]   ;;  %1183 = vmatpush3.bf16.msra.mxu0 %v1304_v3  ;;  %v1309_v8 = vld [vmem:[%s1450_s16 + $0x88] sm:$0xff]   ;;  %v1313_v12 = vld [vmem:[%s1450_s16 + $0x90] sm:$0xff]  }
  0x1b   : > { %1205 = vmatpush3.bf16.msra.mxu1 %v1305_v4  ;;  %1184 = vmatprep.subr.bf16.mxu0 %v1306_v5  ;;  %v1314_v13 = vld [vmem:[%s1450_s16 + $0x58] sm:$0xff]   ;;  %v1318_v18 = vld [vmem:[%s1450_s16 + $0x60] sm:$0xff]   ;;  %v1322_v23 = vld [vmem:[%s1450_s16 + $0x68] sm:$0xff]   ;;  %v326_v25 = vadd.s32 128, %v325_v20  ;;  %v328_v28 = vadd.s32 384, %v325_v20  ;;  %v327_v31 = vadd.s32 256, %v325_v20  ;;  %v330_v37 = vadd.s32 %v329_v27, %v325_v20 }
  0x1c   : > { %1206 = vmatprep.subr.bf16.mxu1 %v1307_v6  ;;  %v1315_v14 = vld [vmem:[%s1450_s16 + $0xd8] sm:$0xff]   ;;  %v1319_v19 = vld [vmem:[%s1450_s16 + $0xe0] sm:$0xff]   ;;  %v1323_v24 = vld [vmem:[%s1450_s16 + $0xe8] sm:$0xff]   ;;  %v1383_v4 = vmov (!%p1165_p6), 0.0  }
  0x1d   : > { %v1316_v16 = vld [vmem:[%s1450_s16 + $0x18] sm:$0xff]   ;;  %v1320_v21 = vld [vmem:[%s1450_s16 + $0x20] sm:$0xff]   ;;  %v1324_v26 = vld [vmem:[%s1450_s16 + $0x28] sm:$0xff]   ;;  %v331_v33 = vadd.s32 %v329_v27, %v326_v25  ;;  %v333_v35 = vadd.s32 %v329_v27, %v328_v28  ;;  %v332_v39 = vadd.s32 %v329_v27, %v327_v31  ;;  %vm334_vm3 = vcmp.lt.s32.totalorder %v330_v37, 5625 }
  0x1e   : > { %1185 = vmatpush3.bf16.msra.mxu0 %v1308_v7  ;;  %v1317_v17 = vld [vmem:[%s1450_s16 + $0x98] sm:$0xff]   ;;  %v1321_v22 = vld [vmem:[%s1450_s16 + $0xa0] sm:$0xff]   ;;  %v1325_v29 = vld [vmem:[%s1450_s16 + $0xa8] sm:$0xff]  }
  0x1f   : > { %1207 = vmatpush3.bf16.msra.mxu1 %v1309_v8  ;;  %1186 = vmatprep.subr.bf16.mxu0 %v1310_v9  ;;  %v1326_v30 = vld [vmem:[%s1450_s16 + $0x70] sm:$0xff]   ;;  %v1330_v38 = vld [vmem:[%s1450_s16 + $0x78] sm:$0xff]   ;;  %vm335_vm1 = vcmp.lt.s32.totalorder %v331_v33, 5625  ;;  %vm337_vm2 = vcmp.lt.s32.totalorder %v333_v35, 5625  ;;  %v338_v43 = vld [vmem:[%s1445_s12] sm:$0xff]  ;;  %vm336_vm5 = vcmp.lt.s32.totalorder %v332_v39, 5625 }
  0x20   : > { %1208 = vmatprep.subr.bf16.mxu1 %v1311_v10  ;;  %v1327_v32 = vld [vmem:[%s1450_s16 + $0xf0] sm:$0xff]   ;;  %v1331_v40 = vld [vmem:[%s1450_s16 + $0xf8] sm:$0xff]   ;;  %vm1153_vm4 = vmpackc.low %vm335_vm1, %vm335_vm1  ;;  %v342_v45 = vcombine.high %v338_v43, %v338_v43  ;;  %v1157_v47 = vpack.c.bf16 %v338_v43, %v338_v43 }
  0x21   : > { %v1328_v34 = vld [vmem:[%s1450_s16 + $0x30] sm:$0xff]   ;;  %v1332_v41 = vld [vmem:[%s1450_s16 + $0x38] sm:$0xff]   ;;  %v339_v44 = vld [vmem:[%s1445_s12 + $0x8] sm:$0xff] }
  0x22   : > { %1187 = vmatpush3.bf16.msra.mxu0 %v1312_v11  ;;  %v1329_v36 = vld [vmem:[%s1450_s16 + $0xb0] sm:$0xff]   ;;  %v1333_v42 = vld [vmem:[%s1450_s16 + $0xb8] sm:$0xff]   ;;  %v343_v46 = vcombine.high %v339_v44, %v339_v44  ;;  %vm1159_vm6 = vmpackc.low %vm337_vm2, %vm337_vm2  ;;  %v1163_v48 = vpack.c.bf16 %v339_v44, %v339_v44  ;;  %v1154_v49 = vpack.c.bf16 %v342_v45, %v342_v45 }
  0x23   : > { %1209 = vmatpush3.bf16.msra.mxu1 %v1313_v12  ;;  %1188 = vmatprep.subr.bf16.mxu0 %v1314_v13  ;;  %vm1156_vm7 = vmpackc.low %vm334_vm3, %vm334_vm3  ;;  %v354_v59 = vld [vmem:[#allocation2] sm:$0xf]  ;;  %v709_v1 = vld [vmem:[%s1587_s2 + $0x8] sm:$0xff] (!%p1165_p6) }
  0x24   : > { %1210 = vmatprep.subr.bf16.mxu1 %v1315_v14  ;;  %v1160_v50 = vpack.c.bf16 %v343_v46, %v343_v46  ;;  %vm1162_vm8 = vmpackc.low %vm336_vm5, %vm336_vm5  ;;  %1155 = vmatprep.mubr.msk.bf16.mxu0 %vm1153_vm4, %v1154_v49  ;;  %v708_v0 = vld [vmem:[%s1587_s2] sm:$0xff] (!%p1165_p6)  ;;  %v860_v33 = vld [vmem:[%s1589_s4 + $0x8] sm:$0xff] (!%p1165_p6) }
  0x25   : > { %v1269_v3 = vpack.c.bf16 (!%p1165_p6), %v709_v1, %v708_v0  ;;  %v707_v5 = vld [vmem:[%s1585_s0] sm:$0xf] (!%p1165_p6)  ;;  %v866_v37 = vld [vmem:[%s1590_s5 + $0x18] sm:$0xff] (!%p1165_p6)  ;;  %v1172_v45 = vld [vmem:[%s1591_s6 + $0x5] ss:$0 sm:$0xff] (!%p1165_p6) }
  0x26   : > { %1189 = vmatpush3.bf16.msra.mxu0 %v1316_v16  ;;  %1161 = vmatprep.mubr.msk.bf16.mxu1 %vm1159_vm6, %v1160_v50  ;;  %v1170_v6 = vld [vmem:[%s1591_s6 + $0x3] ss:$0 sm:$0xff] (!%p1165_p6) }
  0x27   : > { %1211 = vmatpush3.bf16.msra.mxu1 %v1317_v17  ;;  %1190 = vmatprep.subr.bf16.mxu0 %v1318_v18 }
  0x28   : > { %1212 = vmatprep.subr.bf16.mxu1 %v1319_v19 }
  0x2a   : > { %1191 = vmatpush3.bf16.msra.mxu0 %v1320_v21 }
  0x2b   : > { %1213 = vmatpush3.bf16.msra.mxu1 %v1321_v22  ;;  %1192 = vmatprep.subr.bf16.mxu0 %v1322_v23 }
  0x2c   : > { %1214 = vmatprep.subr.bf16.mxu1 %v1323_v24 }
  0x2e   : > { %1193 = vmatpush3.bf16.msra.mxu0 %v1324_v26 }
  0x2f   : > { %1215 = vmatpush3.bf16.msra.mxu1 %v1325_v29  ;;  %1194 = vmatprep.subr.bf16.mxu0 %v1326_v30  ;;  %v863_v29 = vld [vmem:[%s1590_s5] sm:$0xff] (!%p1165_p6)  ;;  %v864_v30 = vld [vmem:[%s1590_s5 + $0x8] sm:$0xff] (!%p1165_p6) }
  0x30   : > { %1216 = vmatprep.subr.bf16.mxu1 %v1327_v32  ;;  %v1272_v31 = vpack.c.bf16 (!%p1165_p6), %v864_v30, %v863_v29  ;;  %v859_v32 = vld [vmem:[%s1589_s4] sm:$0xff] (!%p1165_p6) }
  0x32   : > { %1195 = vmatpush3.bf16.msra.mxu0 %v1328_v34  ;;  %v1278_v34 = vpack.c.bf16 (!%p1165_p6), %v860_v33, %v859_v32 }
  0x33   : > { %1217 = vmatpush3.bf16.msra.mxu1 %v1329_v36  ;;  %1196 = vmatprep.subr.bf16.mxu0 %v1330_v38  ;;  %v865_v36 = vld [vmem:[%s1590_s5 + $0x10] sm:$0xff] (!%p1165_p6) }
  0x34   : > { %1218 = vmatprep.subr.bf16.mxu1 %v1331_v40  ;;  %v1275_v39 = vpack.c.bf16 (!%p1165_p6), %v866_v37, %v865_v36  ;;  %v861_v40 = vld [vmem:[%s1589_s4 + $0x10] sm:$0xff] (!%p1165_p6) }
  0x36   : > { %1197 = vmatpush3.bf16.msra.mxu0 %v1332_v41  ;;  %v862_v41 = vld [vmem:[%s1589_s4 + $0x18] sm:$0xff] (!%p1165_p6) }
  0x37   : > { %1219 = vmatpush3.bf16.msra.mxu1 %v1333_v42  ;;  %1268 = vmatprep.subr.bf16.mxu0 (!%p1165_p6), %v1381_v2  ;;  %v1171_v42 = vld [vmem:[%s1591_s6 + $0x4] ss:$0 sm:$0xff] (!%p1165_p6)  ;;  %v1281_v43 = vpack.c.bf16 (!%p1165_p6), %v862_v41, %v861_v40  ;;  %v1176_v41 = vld [vmem:[%s1592_s7 + $0x1] ss:$0 sm:$0xff] (!%p1165_p6) }
  0x38   : > { %1271 = vmatprep.subr.bf16.mxu1 (!%p1165_p6), %v1381_v2 }
  0x39   : > { %1158 = vmatmul.mubr.msk.bf16.vlgmr.msra.gmra.mrb[0].mxu0 %vm1156_vm7, %v1157_v47  ;;  %v1166_v47 = vld [vmem:[%s1591_s6] ss:$0 sm:$0xff] (!%p1165_p6) }
  0x3a   : > { %1164 = vmatmul.mubr.msk.bf16.vlgmr.msra.gmra.mrb[0].mxu1 %vm1162_vm8, %v1163_v48  ;;  %1243 = vmatprep.mubr.msk.f32.mxu0 (!%p1165_p6), %vm1382_vm10, %v1383_v4 }
  0x3b   : > { %1254 = vmatprep.mubr.msk.f32.mxu1 (!%p1165_p6), %vm1382_vm10, %v1383_v4  ;;  %1270 = vmatpush3.bf16.msra.mxu0 (!%p1165_p6), %v1269_v3 }
  0x3c   : > { %1277 = vmatprep.subr.bf16.mxu0 (!%p1165_p6), %v1381_v2  ;;  %1273 = vmatpush3.bf16.msra.mxu1 (!%p1165_p6), %v1272_v31 }
  0x3d   : > { %1274 = vmatprep.subr.bf16.mxu1 (!%p1165_p6), %v1381_v2 }
  0x40   : > { %1276 = vmatpush3.bf16.msra.mxu1 (!%p1165_p6), %v1275_v39 }
 0x10c   : > { %v1198_v51 = vpop.f32.mrb[0].mxu0 }
 0x10d   : > { %v1220_v52 = vpop.f32.mrb[0].mxu1  ;;  %v1199_v53 = vpop.f32.mrb[1].mxu0  ;;  %1244 = vmatmul.mubr.msk.f32.vlgmr.msra.gmra.mrb[0].mxu0 (!%p1165_p6), %vm714_vm11, %v707_v5 }
 0x10e   : > { %v1221_v54 = vpop.f32.mrb[1].mxu1  ;;  %v1200_v55 = vadd.f32 %v1199_v53, %v1198_v51  ;;  %v1201_v57 = vpop.f32.mrb[2].mxu0  ;;  %1265 = vmatprep.mubr.msk.f32.mxu0 (!%p1165_p6), %vm1382_vm10, %v1383_v4  ;;  %1279 = vmatpush3.bf16.msra.mxu0 (!%p1165_p6), %v1278_v34 }
 0x10f   : > { %v1222_v56 = vadd.f32 %v1221_v54, %v1220_v52  ;;  %v1223_v58 = vpop.f32.mrb[2].mxu1  ;;  %v1202_v60 = vpop.f32.mrb[3].mxu0  ;;  %697 = sbr.rel (%p1165_p6) target bundleno = 810 (0x32a), region = 60  ;;  %1280 = vmatprep.subr.bf16.mxu0 (!%p1165_p6), %v1381_v2 }
 0x110   : > { %v1224_v61 = vpop.f32.mrb[3].mxu1 }
 0x111   : > { %v686_v62 = vadd.f32 %v1222_v56, %v1200_v55 }
 0x112   : > { %1282 = vmatpush3.bf16.msra.mxu0 (!%p1165_p6), %v1281_v43  ;;  %v1177_v43 = vld [vmem:[%s1592_s7 + $0x2] ss:$0 sm:$0xff] (!%p1165_p6) }
 0x113   : > { %v691_v63 = vadd.f32 %v686_v62, %v354_v59 }
 0x115   : > { %693 = vst.msk [vmem:[#allocation2] sm:$0xf] %vm692_vm9, %v691_v63 }
 0x11c   : > { %v821_v7 = vld [vmem:[#allocation2] sm:$0xf] }
 0x11d   : > { %v826_v8 = vadd.f32 %v1170_v6, %v821_v7 }
 0x11f   : > { %v827_v9 = vmax.f32 %v826_v8, 0.0  ;;  %v1168_v8 = vld [vmem:[%s1591_s6 + $0x1] ss:$0 sm:$0xff] }
 0x121   : > { %v828_v10 = vsel %vm692_vm9, %v827_v9, 0.0 }
 0x122   : > { %v829_v11 = vrot.slane %v828_v10, 4 }
 0x124   : > { %v830_v12 = vadd.f32 %v829_v11, %v828_v10  ;;  %v1169_v10 = vld [vmem:[%s1591_s6 + $0x2] ss:$0 sm:$0xff] }
 0x126   : > { %v831_v13 = vrot.slane %v830_v12, 2 }
 0x128   : > { %v832_v14 = vadd.f32 %v831_v13, %v830_v12 }
 0x12a   : > { %v833_v15 = vrot.slane %v832_v14, 1 }
 0x12c   : > { %v834_v16 = vadd.f32 %v833_v15, %v832_v14  ;;  %v1175_v15 = vld [vmem:[%s1592_s7] ss:$0 sm:$0xff] }
 0x12e   : > { %v835_v17 = vmul.f32 0.25, %v834_v16 }
 0x130   : > { %v836_v18 = vsub.f32 %v827_v9, %v835_v17 }
 0x132   : > { %v837_v19 = vmul.f32 %v836_v18, %v836_v18 }
 0x134   : > { %v838_v20 = vsel %vm692_vm9, %v837_v19, 0.0 }
 0x135   : > { %v839_v21 = vrot.slane %v838_v20, 4 }
 0x137   : > { %v840_v22 = vadd.f32 %v839_v21, %v838_v20 }
 0x139   : > { %v841_v23 = vrot.slane %v840_v22, 2 }
 0x13b   : > { %v842_v24 = vadd.f32 %v841_v23, %v840_v22 }
 0x13d   : > { %v843_v25 = vrot.slane %v842_v24, 1 }
 0x13f   : > { %v844_v26 = vadd.f32 %v843_v25, %v842_v24 }
 0x141   : > { %v845_v27 = vmul.f32 0.25, %v844_v26 }
 0x143   : > { %v846_v28 = vadd.f32 1e-05, %v845_v27 }
 0x145   : > { %1336 = vrsqrt.f32 %v846_v28 }
 0x14f   : > { %v1337_v35 = vpop.eup %1336 }
 0x150   : > { %v848_v38 = vmul.f32 %v1337_v35, %v836_v18 }
 0x152   : > { %v853_v44 = vmul.f32 %v1171_v42, %v848_v38 }
 0x154   : > { %v858_v46 = vadd.f32 %v1172_v45, %v853_v44 }
 0x156   : > { %1255 = vmatmul.mubr.msk.f32.vlgmr.msra.gmra.mrb[0].mxu1 %vm867_vm12, %v858_v46 }
 0x1e0   : > { %v784_v48 = vpop.f32.mrb[0].mxu0 }
 0x1e1   : > { %v785_v49 = vadd.f32 %v1166_v47, %v784_v48  ;;  %v1245_v50 = vpop.f32.mrb[1].mxu0 }
 0x1e3   : > { %v788_v51 = vmax.f32 %v785_v49, 0.0 }
 0x1e5   : > { %v789_v52 = vsel %vm692_vm9, %v788_v51, 0.0 }
 0x1e6   : > { %v790_v53 = vrot.slane %v789_v52, 4 }
 0x1e8   : > { %v791_v54 = vadd.f32 %v790_v53, %v789_v52 }
 0x1ea   : > { %v792_v55 = vrot.slane %v791_v54, 2 }
 0x1ec   : > { %v793_v56 = vadd.f32 %v792_v55, %v791_v54 }
 0x1ee   : > { %v794_v57 = vrot.slane %v793_v56, 1 }
 0x1f0   : > { %v795_v58 = vadd.f32 %v794_v57, %v793_v56 }
 0x1f2   : > { %v797_v59 = vmul.f32 0.25, %v795_v58 }
 0x1f4   : > { %v798_v60 = vsub.f32 %v788_v51, %v797_v59 }
 0x1f6   : > { %v799_v61 = vmul.f32 %v798_v60, %v798_v60 }
 0x1f8   : > { %v800_v62 = vsel %vm692_vm9, %v799_v61, 0.0 }
 0x1f9   : > { %v801_v63 = vrot.slane %v800_v62, 4 }
 0x1fb   : > { %v802_v0 = vadd.f32 %v801_v63, %v800_v62 }
 0x1fd   : > { %v803_v1 = vrot.slane %v802_v0, 2 }
 0x1ff   : > { %v804_v2 = vadd.f32 %v803_v1, %v802_v0 }
 0x201   : > { %v805_v3 = vrot.slane %v804_v2, 1 }
 0x203   : > { %v806_v4 = vadd.f32 %v805_v3, %v804_v2 }
 0x205   : > { %v807_v5 = vmul.f32 0.25, %v806_v4 }
 0x207   : > { %v808_v6 = vadd.f32 1e-05, %v807_v5 }
 0x209   : > { %1338 = vrsqrt.f32 %v808_v6 }
 0x213   : > { %v1339_v7 = vpop.eup %1338 }
 0x214   : > { %v810_v9 = vmul.f32 %v1339_v7, %v798_v60 }
 0x216   : > { %v815_v11 = vmul.f32 %v1168_v8, %v810_v9 }
 0x218   : > { %v820_v12 = vadd.f32 %v1169_v10, %v815_v11 }
 0x21a   : > { %1266 = vmatmul.mubr.msk.f32.vlgmr.msra.gmra.mrb[2].mxu0 %vm867_vm12, %v820_v12 }
 0x229   : > { %v937_v13 = vpop.f32.mrb[0].mxu1 }
 0x22a   : > { %v1256_v14 = vpop.f32.mrb[1].mxu1 }
 0x2ed   : > { %v1010_v16 = vpop.f32.mrb[2].mxu0 }
 0x2ee   : > { %v1011_v17 = vadd.f32 %v1010_v16, %v937_v13  ;;  %v1267_v18 = vpop.f32.mrb[3].mxu0 }
 0x2f0   : > { %v1018_v19 = vadd.f32 %v1175_v15, %v1011_v17 }
 0x2f2   : > { %v1019_v20 = vmax.f32 %v1018_v19, 0.0 }
 0x2f4   : > { %v1021_v21 = vsel %vm1020_vm13, %v1019_v20, 0.0 }
 0x2f5   : > { %v1022_v22 = vrot.slane %v1021_v21, 4 }
 0x2f7   : > { %v1023_v23 = vadd.f32 %v1022_v22, %v1021_v21 }
 0x2f9   : > { %v1024_v24 = vrot.slane %v1023_v23, 2 }
 0x2fb   : > { %v1025_v25 = vadd.f32 %v1024_v24, %v1023_v23 }
 0x2fd   : > { %v1026_v26 = vrot.slane %v1025_v25, 1 }
 0x2ff   : > { %v1027_v27 = vadd.f32 %v1026_v26, %v1025_v25 }
 0x301   : > { %v1028_v28 = vmul.f32 0.25, %v1027_v27 }
 0x303   : > { %v1029_v29 = vsub.f32 %v1019_v20, %v1028_v28 }
 0x305   : > { %v1030_v30 = vmul.f32 %v1029_v29, %v1029_v29 }
 0x307   : > { %v1031_v31 = vsel %vm1020_vm13, %v1030_v30, 0.0 }
 0x308   : > { %v1032_v32 = vrot.slane %v1031_v31, 4 }
 0x30a   : > { %v1033_v33 = vadd.f32 %v1032_v32, %v1031_v31 }
 0x30c   : > { %v1034_v34 = vrot.slane %v1033_v33, 2 }
 0x30e   : > { %v1035_v35 = vadd.f32 %v1034_v34, %v1033_v33 }
 0x310   : > { %v1036_v36 = vrot.slane %v1035_v35, 1 }
 0x312   : > { %v1037_v37 = vadd.f32 %v1036_v36, %v1035_v35 }
 0x314   : > { %v1038_v38 = vmul.f32 0.25, %v1037_v37 }
 0x316   : > { %v1039_v39 = vadd.f32 1e-05, %v1038_v38 }
 0x318   : > { %1340 = vrsqrt.f32 %v1039_v39 }
 0x322   : > { %v1341_v40 = vpop.eup %1340 }
 0x323   : > { %v1041_v42 = vmul.f32 %v1341_v40, %v1029_v29 }
 0x325   : > { %v1046_v44 = vmul.f32 %v1176_v41, %v1041_v42 }
 0x327   : > { %v1051_v45 = vadd.f32 %v1177_v43, %v1046_v44 }
 0x329   : > { %1052 = vst.msk [vmem:[#allocation3] sm:$0xf] %vm1020_vm13, %v1051_v45 }
 0x32a PF: > { %p1287_p7 = scmp.eq.s32.totalorder %s1436_s28, 10  ;;  %s1384_s18 = smov [#allocation3]  }
 0x32b   : > { %s1060_s19 = sshll.u32 %s1384_s18, 4  ;;  %s1061_s19 = int_to_ptr.vmem [resolvable:$true] %s1060_s19 }
 0x32c   : > { %s1342_s20 = scalar_lea.vmem %s1061_s19, 64  ;;  %p1349_p11 = scmp.lt.s32.totalorder %s1061_s19, %s1061_s19 }
 0x32d   : > { %p1343_p8 = scmp.ne.s32.totalorder %s1061_s19, %s1342_s20  ;;  %p1350_p12 = scmp.lt.s32.totalorder %s1342_s20, %s1342_s20 }
 0x32f   : > { %p1344_p9 = pnand %p1343_p8, %p1287_p7  ;;  %p1351_p13 = por %p1350_p12, %p1349_p11 }
 0x331   : > { %p1345_p10 = pneg %p1344_p9 }
 0x333   : > { %p1352_p0 = pnand %p1351_p13, %p1345_p10 }
 0x335   : > { %1355 = shalt.err (!%p1352_p0)
}
 0x336   : > { %s1356_s23 = scalar_lea.hbm %s1593_s8, 64 }
 0x337   : > { %p1357_p1 = scmp.ne.s32.totalorder %s1593_s8, %s1356_s23  ;;  %p1362_p4 = scmp.lt.u32.totalorder %s1356_s23, %s1593_s8 }
 0x339   : > { %p1358_p2 = pnand %p1357_p1, %p1287_p7 }
 0x33b   : > { %p1359_p3 = pneg %p1358_p2 }
 0x33d   : > { %p1364_p5 = pnand %p1362_p4, %p1359_p3 }
 0x33f   : > { %1367 = shalt.err (!%p1364_p5)
}
 0x340   : > { %1284 = dma.vmem_to_hbm [thread:$0]  (%p1287_p7), %s1061_s19, 64, %s1593_s8, [#allocation4]  }
 0x341   : > { %1373 = dma.done.wait (%p1287_p7), [#allocation4], 64  }
 0x342   : > { %1375 = vsyncadd (%p1287_p7), [#allocation4], 4294967232 }
 0x343 PF: > { %s19_s27 = sadd.s32 1, %s1378_s27  }
 0x344   : > { %p16_p6 = scmp.ge.s32.totalorder %s19_s27, 13  }
 0x346   :  { %18 = sbr.rel (!%p16_p6) target bundleno = 1 (0x1), region = 90 }
 0x34d   :  { %1073 = vsyncpa [#allocation4], 1 }
 0x34e   :  { %1075 = vsyncpa [#allocation4 + $0x1], 1 }

</bundles_post_ra>
